<compile_context>
chip_gen: v7x
topology: tpu7x:2x2x1
jax: 0.10.0
libtpu: 0.0.40
codegen_flags: <defaults>
</compile_context>

<pallas_src>
import jax
import jax.numpy as jnp
import numpy as np
from jax.experimental import pallas as pl
from jax.experimental.pallas import tpu as pltpu


def _round_up(n: int, m: int) -> int:
    return ((n + m - 1) // m) * m


def _default_num_row_blocks() -> int:
    """2 row blocks on v7x (2 TensorCores/chip), 1 elsewhere."""
    try:
        kind = jax.devices()[0].device_kind.lower()
    except Exception:
        return 1
    return 2 if "v7" in kind else 1


def _make_kernel(n_hidden_layers: int, t_per_block: int, bp: int):
    """Builds the kernel closure over the static layer count / tiling."""

    def kernel(h_idx_ref, x_ref, *rest):
        # rest = (w0, b0, w1, b1, ..., wh, bh, o_ref)
        wh_ref = rest[2 * n_hidden_layers]
        bh_ref = rest[2 * n_hidden_layers + 1]
        o_ref = rest[2 * n_hidden_layers + 2]

        # Shared MLP: one pair of matmuls over ALL fused rows (T*Bp at once).
        # Biases are (1, h) broadcast-adds executed once per grid step.
        a = x_ref[...]
        for li in range(n_hidden_layers):
            w_ref = rest[2 * li]
            b_ref = rest[2 * li + 1]
            a = jnp.tanh(
                jnp.dot(a, w_ref[...], preferred_element_type=jnp.float32)
                + b_ref[...]
            )

        # Per-timestep head selection from the VMEM-resident head bank.
        # t_per_block is tiny (<= T), so a static unrolled loop is fine; each
        # head matmul is a single small MXU push.
        t0 = pl.program_id(0) * t_per_block
        for t in range(t_per_block):
            h = h_idx_ref[t0 + t]          # scalar from SMEM (prefetched)
            w_t = wh_ref[h]                # (h_last, nout), dynamic 1st-axis load
            b_t = bh_ref[h]                # (1, nout)
            rows = a[t * bp:(t + 1) * bp, :]
            o_ref[pl.ds(t * bp, bp), :] = (
                jnp.dot(rows, w_t, preferred_element_type=jnp.float32) + b_t
            )

    return kernel


def fh_value_forward_batched(x, h_idx, params, *, num_row_blocks=None):
    """Batched multi-timestep forward.

    x:     (T, B, num_inputs) f32 -- one activation slab per timestep/request.
    h_idx: (T,) int            -- head (timestep) index for each slab.
    Returns (T, B, num_outputs) f32.
    """
    ws, bs = params["ws"], params["bs"]
    wh, bh = params["wh"], params["bh"]

    T, B, nin = x.shape
    H, h_last, nout = wh.shape
    n_hidden = len(ws)

    # Sublane-pad the batch (only materializes a pad op if B % 8 != 0).
    Bp = _round_up(max(B, 1), 8)
    if Bp != B:
        x = jnp.pad(x, ((0, 0), (0, Bp - B), (0, 0)))
    R = T * Bp
    x_flat = x.reshape(R, nin)

    # Clamp the head index so a bad value can never index past the head bank.
    h_idx = jnp.clip(jnp.asarray(h_idx, jnp.int32).reshape(T), 0, H - 1)

    # Row-block split: 2 on v7x (one block per TensorCore), else 1.
    nb = num_row_blocks if num_row_blocks is not None else _default_num_row_blocks()
    if nb < 1 or T % nb != 0:
        nb = 1
    t_per_block = T // nb
    rows_per_block = t_per_block * Bp

    def _resident(arr):
        # Whole-array block + constant index_map -> DMA'd once, VMEM-resident.
        nd = arr.ndim
        return pl.BlockSpec(arr.shape, lambda i, hi, _nd=nd: (0,) * _nd)

    in_specs = [pl.BlockSpec((rows_per_block, nin), lambda i, hi: (i, 0))]
    flat_params = []
    for w, b in zip(ws, bs):
        in_specs += [_resident(w), _resident(b)]
        flat_params += [w, b]
    in_specs += [_resident(wh), _resident(bh)]
    flat_params += [wh, bh]

    grid_spec = pltpu.PrefetchScalarGridSpec(
        num_scalar_prefetch=1,
        grid=(nb,),
        in_specs=in_specs,
        out_specs=pl.BlockSpec((rows_per_block, nout), lambda i, hi: (i, 0)),
    )

    out = pl.pallas_call(
        _make_kernel(n_hidden, t_per_block, Bp),
        out_shape=jax.ShapeDtypeStruct((R, nout), jnp.float32),
        grid_spec=grid_spec,
        compiler_params=pltpu.CompilerParams(
            # Row blocks are independent: shards across v7x's two TensorCores;
            # harmless no-op at grid=(1,) on v5e/v6e.
            dimension_semantics=("parallel",),
        ),
    )(h_idx, x_flat, *flat_params)

    out = out.reshape(T, Bp, nout)
    if Bp != B:
        out = out[:, :B, :]
    return out


def fh_value_forward(x, h, params):
    """Original module signature: x (B, num_inputs) f32, integer timestep h."""
    out = fh_value_forward_batched(
        x[None], jnp.asarray([h], jnp.int32), params, num_row_blocks=1
    )
    return out[0]


def init_params(key, num_inputs, num_hiddens, num_outputs, H):
    """Init mimicking torch.nn.Linear default (U(-k, k), k = 1/sqrt(fan_in)),
    with head weights scaled by 0.1 and head biases zeroed, as in __init__."""
    params = {"ws": [], "bs": []}
    keys = jax.random.split(key, 2 * len(num_hiddens) + 1)
    fan_in = num_inputs
    for li, h in enumerate(num_hiddens):
        k = 1.0 / np.sqrt(fan_in)
        params["ws"].append(
            jax.random.uniform(keys[2 * li], (fan_in, h), jnp.float32, -k, k)
        )
        params["bs"].append(
            jax.random.uniform(keys[2 * li + 1], (1, h), jnp.float32, -k, k)
        )
        fan_in = h
    k = 1.0 / np.sqrt(fan_in)
    params["wh"] = 0.1 * jax.random.uniform(
        keys[-1], (H, fan_in, num_outputs), jnp.float32, -k, k
    )
    params["bh"] = jnp.zeros((H, 1, num_outputs), jnp.float32)
    return params


def reference_forward(x, h, params):
    a = x
    for w, b in zip(params["ws"], params["bs"]):
        a = jnp.tanh(a @ w + b)
    return a @ params["wh"][h] + params["bh"][h]


if __name__ == "__main__":
    # Small shapes consistent with the module; T timesteps batched per call.
    T = 8
    B = 32
    num_inputs = 16
    num_hiddens = [32, 32]
    num_outputs = 4
    H = 6

    key = jax.random.PRNGKey(0)
    pkey, xkey, hkey = jax.random.split(key, 3)
    params = init_params(pkey, num_inputs, num_hiddens, num_outputs, H)
    x = jax.random.normal(xkey, (T, B, num_inputs), jnp.float32)
    h_idx = jax.random.randint(hkey, (T,), 0, H, dtype=jnp.int32)

    # Batched multi-timestep path (single grid step, or 2 on v7x).
    out = jax.block_until_ready(fh_value_forward_batched(x, h_idx, params))
    assert out.shape == (T, B, num_outputs)
    h_host = np.asarray(h_idx)
    ref = jnp.stack(
        [reference_forward(x[t], int(h_host[t]), params) for t in range(T)]
    )
    np.testing.assert_allclose(np.asarray(out), np.asarray(ref), rtol=1e-5, atol=1e-5)

    # Original single-(x, h) API, built on the same kernel.
    out1 = jax.block_until_ready(fh_value_forward(x[0], 2, params))
    ref1 = reference_forward(x[0], 2, params)
    np.testing.assert_allclose(np.asarray(out1), np.asarray(ref1), rtol=1e-5, atol=1e-5)

    print("KERNEL_OK")
</pallas_src>

<mosaic_0001>
module attributes {stable_mosaic.version = 11 : i64} {
  func.func @kernel(%arg0: i32, %arg1: memref<8xi32, #tpu.memory_space<smem>>, %arg2: memref<256x16xf32, #tpu.memory_space<vmem>>, %arg3: memref<16x32xf32, #tpu.memory_space<vmem>>, %arg4: memref<1x32xf32, #tpu.memory_space<vmem>>, %arg5: memref<32x32xf32, #tpu.memory_space<vmem>>, %arg6: memref<1x32xf32, #tpu.memory_space<vmem>>, %arg7: memref<6x32x4xf32, #tpu.memory_space<vmem>>, %arg8: memref<6x1x4xf32, #tpu.memory_space<vmem>>, %arg9: memref<256x4xf32, #tpu.memory_space<vmem>>) attributes {dimension_semantics = [#tpu.dimension_semantics<parallel>], iteration_bounds = array<i64: 1>, scalar_prefetch = 1 : i64, scratch_operands = 0 : i64, tpu.core_type = #tpu.core_type<tc>, window_params = [{transform_indices = @transform_0, window_bounds = array<i64: 256, 16>}, {pipeline_mode = #tpu.pipeline_mode<synchronous>, transform_indices = @transform_1, window_bounds = array<i64: 16, 32>}, {pipeline_mode = #tpu.pipeline_mode<synchronous>, transform_indices = @transform_2, window_bounds = array<i64: 1, 32>}, {pipeline_mode = #tpu.pipeline_mode<synchronous>, transform_indices = @transform_3, window_bounds = array<i64: 32, 32>}, {pipeline_mode = #tpu.pipeline_mode<synchronous>, transform_indices = @transform_4, window_bounds = array<i64: 1, 32>}, {pipeline_mode = #tpu.pipeline_mode<synchronous>, transform_indices = @transform_5, window_bounds = array<i64: 6, 32, 4>}, {pipeline_mode = #tpu.pipeline_mode<synchronous>, transform_indices = @transform_6, window_bounds = array<i64: 6, 1, 4>}, {transform_indices = @transform_7, window_bounds = array<i64: 256, 4>}]} {
    %c0 = arith.constant 0 : index
    %c0_0 = arith.constant 0 : index
    %0 = vector.load %arg2[%c0, %c0_0] : memref<256x16xf32, #tpu.memory_space<vmem>>, vector<256x16xf32>
    %c0_1 = arith.constant 0 : index
    %c0_2 = arith.constant 0 : index
    %1 = vector.load %arg3[%c0_1, %c0_2] : memref<16x32xf32, #tpu.memory_space<vmem>>, vector<16x32xf32>
    %cst = arith.constant dense<0.000000e+00> : vector<256x32xf32>
    %2 = tpu.matmul %0, %1, %cst {dimension_numbers = #tpu.dot_dimension_numbers<[1], [0], [0], [1], [0, 0, 1, 1], [], []>} : vector<256x16xf32>, vector<16x32xf32>, vector<256x32xf32> -> vector<256x32xf32>
    %c0_3 = arith.constant 0 : index
    %c0_4 = arith.constant 0 : index
    %3 = vector.load %arg4[%c0_3, %c0_4] : memref<1x32xf32, #tpu.memory_space<vmem>>, vector<1x32xf32>
    %4 = vector.broadcast %3 : vector<1x32xf32> to vector<256x32xf32>
    %5 = arith.addf %2, %4 : vector<256x32xf32>
    %6 = math.tanh %5 : vector<256x32xf32>
    %c0_5 = arith.constant 0 : index
    %c0_6 = arith.constant 0 : index
    %7 = vector.load %arg5[%c0_5, %c0_6] : memref<32x32xf32, #tpu.memory_space<vmem>>, vector<32x32xf32>
    %cst_7 = arith.constant dense<0.000000e+00> : vector<256x32xf32>
    %8 = tpu.matmul %6, %7, %cst_7 {dimension_numbers = #tpu.dot_dimension_numbers<[1], [0], [0], [1], [0, 0, 1, 1], [], []>} : vector<256x32xf32>, vector<32x32xf32>, vector<256x32xf32> -> vector<256x32xf32>
    %c0_8 = arith.constant 0 : index
    %c0_9 = arith.constant 0 : index
    %9 = vector.load %arg6[%c0_8, %c0_9] : memref<1x32xf32, #tpu.memory_space<vmem>>, vector<1x32xf32>
    %10 = vector.broadcast %9 : vector<1x32xf32> to vector<256x32xf32>
    %11 = arith.addf %8, %10 : vector<256x32xf32>
    %12 = math.tanh %11 : vector<256x32xf32>
    %c8_i32 = arith.constant 8 : i32
    %13 = arith.muli %arg0, %c8_i32 : i32
    %c0_i32 = arith.constant 0 : i32
    %14 = arith.addi %13, %c0_i32 : i32
    %15 = arith.index_cast %14 : i32 to index
    %16 = memref.load %arg1[%15] : memref<8xi32, #tpu.memory_space<smem>>
    %17 = arith.index_cast %16 : i32 to index
    %c0_10 = arith.constant 0 : index
    %c0_11 = arith.constant 0 : index
    %18 = vector.load %arg7[%17, %c0_10, %c0_11] : memref<6x32x4xf32, #tpu.memory_space<vmem>>, vector<1x32x4xf32>
    %19 = vector.shape_cast %18 : vector<1x32x4xf32> to vector<32x4xf32>
    %20 = arith.index_cast %16 : i32 to index
    %c0_12 = arith.constant 0 : index
    %c0_13 = arith.constant 0 : index
    %21 = vector.load %arg8[%20, %c0_12, %c0_13] : memref<6x1x4xf32, #tpu.memory_space<vmem>>, vector<1x1x4xf32>
    %22 = vector.shape_cast %21 : vector<1x1x4xf32> to vector<1x4xf32>
    %23 = vector.extract_strided_slice %12 {offsets = [0, 0], sizes = [32, 32], strides = [1, 1]} : vector<256x32xf32> to vector<32x32xf32>
    %cst_14 = arith.constant dense<0.000000e+00> : vector<32x4xf32>
    %24 = tpu.matmul %23, %19, %cst_14 {dimension_numbers = #tpu.dot_dimension_numbers<[1], [0], [0], [1], [0, 0, 1, 1], [], []>} : vector<32x32xf32>, vector<32x4xf32>, vector<32x4xf32> -> vector<32x4xf32>
    %25 = vector.broadcast %22 : vector<1x4xf32> to vector<32x4xf32>
    %26 = arith.addf %24, %25 : vector<32x4xf32>
    %c0_15 = arith.constant 0 : index
    %c0_16 = arith.constant 0 : index
    %27 = vector.load %arg9[%c0_15, %c0_16] : memref<256x4xf32, #tpu.memory_space<vmem>>, vector<32x4xf32>
    tpu.vector_store %arg9[%c0_15, %c0_16], %26 {strides = array<i32>} : memref<256x4xf32, #tpu.memory_space<vmem>>, vector<32x4xf32>,
    %c1_i32 = arith.constant 1 : i32
    %28 = arith.addi %13, %c1_i32 : i32
    %29 = arith.index_cast %28 : i32 to index
    %30 = memref.load %arg1[%29] : memref<8xi32, #tpu.memory_space<smem>>
    %31 = arith.index_cast %30 : i32 to index
    %c0_17 = arith.constant 0 : index
    %c0_18 = arith.constant 0 : index
    %32 = vector.load %arg7[%31, %c0_17, %c0_18] : memref<6x32x4xf32, #tpu.memory_space<vmem>>, vector<1x32x4xf32>
    %33 = vector.shape_cast %32 : vector<1x32x4xf32> to vector<32x4xf32>
    %34 = arith.index_cast %30 : i32 to index
    %c0_19 = arith.constant 0 : index
    %c0_20 = arith.constant 0 : index
    %35 = vector.load %arg8[%34, %c0_19, %c0_20] : memref<6x1x4xf32, #tpu.memory_space<vmem>>, vector<1x1x4xf32>
    %36 = vector.shape_cast %35 : vector<1x1x4xf32> to vector<1x4xf32>
    %37 = vector.extract_strided_slice %12 {offsets = [32, 0], sizes = [32, 32], strides = [1, 1]} : vector<256x32xf32> to vector<32x32xf32>
    %cst_21 = arith.constant dense<0.000000e+00> : vector<32x4xf32>
    %38 = tpu.matmul %37, %33, %cst_21 {dimension_numbers = #tpu.dot_dimension_numbers<[1], [0], [0], [1], [0, 0, 1, 1], [], []>} : vector<32x32xf32>, vector<32x4xf32>, vector<32x4xf32> -> vector<32x4xf32>
    %39 = vector.broadcast %36 : vector<1x4xf32> to vector<32x4xf32>
    %40 = arith.addf %38, %39 : vector<32x4xf32>
    %c32 = arith.constant 32 : index
    %c0_22 = arith.constant 0 : index
    %41 = vector.load %arg9[%c32, %c0_22] : memref<256x4xf32, #tpu.memory_space<vmem>>, vector<32x4xf32>
    tpu.vector_store %arg9[%c32, %c0_22], %40 {strides = array<i32>} : memref<256x4xf32, #tpu.memory_space<vmem>>, vector<32x4xf32>,
    %c2_i32 = arith.constant 2 : i32
    %42 = arith.addi %13, %c2_i32 : i32
    %43 = arith.index_cast %42 : i32 to index
    %44 = memref.load %arg1[%43] : memref<8xi32, #tpu.memory_space<smem>>
    %45 = arith.index_cast %44 : i32 to index
    %c0_23 = arith.constant 0 : index
    %c0_24 = arith.constant 0 : index
    %46 = vector.load %arg7[%45, %c0_23, %c0_24] : memref<6x32x4xf32, #tpu.memory_space<vmem>>, vector<1x32x4xf32>
    %47 = vector.shape_cast %46 : vector<1x32x4xf32> to vector<32x4xf32>
    %48 = arith.index_cast %44 : i32 to index
    %c0_25 = arith.constant 0 : index
    %c0_26 = arith.constant 0 : index
    %49 = vector.load %arg8[%48, %c0_25, %c0_26] : memref<6x1x4xf32, #tpu.memory_space<vmem>>, vector<1x1x4xf32>
    %50 = vector.shape_cast %49 : vector<1x1x4xf32> to vector<1x4xf32>
    %51 = vector.extract_strided_slice %12 {offsets = [64, 0], sizes = [32, 32], strides = [1, 1]} : vector<256x32xf32> to vector<32x32xf32>
    %cst_27 = arith.constant dense<0.000000e+00> : vector<32x4xf32>
    %52 = tpu.matmul %51, %47, %cst_27 {dimension_numbers = #tpu.dot_dimension_numbers<[1], [0], [0], [1], [0, 0, 1, 1], [], []>} : vector<32x32xf32>, vector<32x4xf32>, vector<32x4xf32> -> vector<32x4xf32>
    %53 = vector.broadcast %50 : vector<1x4xf32> to vector<32x4xf32>
    %54 = arith.addf %52, %53 : vector<32x4xf32>
    %c64 = arith.constant 64 : index
    %c0_28 = arith.constant 0 : index
    %55 = vector.load %arg9[%c64, %c0_28] : memref<256x4xf32, #tpu.memory_space<vmem>>, vector<32x4xf32>
    tpu.vector_store %arg9[%c64, %c0_28], %54 {strides = array<i32>} : memref<256x4xf32, #tpu.memory_space<vmem>>, vector<32x4xf32>,
    %c3_i32 = arith.constant 3 : i32
    %56 = arith.addi %13, %c3_i32 : i32
    %57 = arith.index_cast %56 : i32 to index
    %58 = memref.load %arg1[%57] : memref<8xi32, #tpu.memory_space<smem>>
    %59 = arith.index_cast %58 : i32 to index
    %c0_29 = arith.constant 0 : index
    %c0_30 = arith.constant 0 : index
    %60 = vector.load %arg7[%59, %c0_29, %c0_30] : memref<6x32x4xf32, #tpu.memory_space<vmem>>, vector<1x32x4xf32>
    %61 = vector.shape_cast %60 : vector<1x32x4xf32> to vector<32x4xf32>
    %62 = arith.index_cast %58 : i32 to index
    %c0_31 = arith.constant 0 : index
    %c0_32 = arith.constant 0 : index
    %63 = vector.load %arg8[%62, %c0_31, %c0_32] : memref<6x1x4xf32, #tpu.memory_space<vmem>>, vector<1x1x4xf32>
    %64 = vector.shape_cast %63 : vector<1x1x4xf32> to vector<1x4xf32>
    %65 = vector.extract_strided_slice %12 {offsets = [96, 0], sizes = [32, 32], strides = [1, 1]} : vector<256x32xf32> to vector<32x32xf32>
    %cst_33 = arith.constant dense<0.000000e+00> : vector<32x4xf32>
    %66 = tpu.matmul %65, %61, %cst_33 {dimension_numbers = #tpu.dot_dimension_numbers<[1], [0], [0], [1], [0, 0, 1, 1], [], []>} : vector<32x32xf32>, vector<32x4xf32>, vector<32x4xf32> -> vector<32x4xf32>
    %67 = vector.broadcast %64 : vector<1x4xf32> to vector<32x4xf32>
    %68 = arith.addf %66, %67 : vector<32x4xf32>
    %c96 = arith.constant 96 : index
    %c0_34 = arith.constant 0 : index
    %69 = vector.load %arg9[%c96, %c0_34] : memref<256x4xf32, #tpu.memory_space<vmem>>, vector<32x4xf32>
    tpu.vector_store %arg9[%c96, %c0_34], %68 {strides = array<i32>} : memref<256x4xf32, #tpu.memory_space<vmem>>, vector<32x4xf32>,
    %c4_i32 = arith.constant 4 : i32
    %70 = arith.addi %13, %c4_i32 : i32
    %71 = arith.index_cast %70 : i32 to index
    %72 = memref.load %arg1[%71] : memref<8xi32, #tpu.memory_space<smem>>
    %73 = arith.index_cast %72 : i32 to index
    %c0_35 = arith.constant 0 : index
    %c0_36 = arith.constant 0 : index
    %74 = vector.load %arg7[%73, %c0_35, %c0_36] : memref<6x32x4xf32, #tpu.memory_space<vmem>>, vector<1x32x4xf32>
    %75 = vector.shape_cast %74 : vector<1x32x4xf32> to vector<32x4xf32>
    %76 = arith.index_cast %72 : i32 to index
    %c0_37 = arith.constant 0 : index
    %c0_38 = arith.constant 0 : index
    %77 = vector.load %arg8[%76, %c0_37, %c0_38] : memref<6x1x4xf32, #tpu.memory_space<vmem>>, vector<1x1x4xf32>
    %78 = vector.shape_cast %77 : vector<1x1x4xf32> to vector<1x4xf32>
    %79 = vector.extract_strided_slice %12 {offsets = [128, 0], sizes = [32, 32], strides = [1, 1]} : vector<256x32xf32> to vector<32x32xf32>
    %cst_39 = arith.constant dense<0.000000e+00> : vector<32x4xf32>
    %80 = tpu.matmul %79, %75, %cst_39 {dimension_numbers = #tpu.dot_dimension_numbers<[1], [0], [0], [1], [0, 0, 1, 1], [], []>} : vector<32x32xf32>, vector<32x4xf32>, vector<32x4xf32> -> vector<32x4xf32>
    %81 = vector.broadcast %78 : vector<1x4xf32> to vector<32x4xf32>
    %82 = arith.addf %80, %81 : vector<32x4xf32>
    %c128 = arith.constant 128 : index
    %c0_40 = arith.constant 0 : index
    %83 = vector.load %arg9[%c128, %c0_40] : memref<256x4xf32, #tpu.memory_space<vmem>>, vector<32x4xf32>
    tpu.vector_store %arg9[%c128, %c0_40], %82 {strides = array<i32>} : memref<256x4xf32, #tpu.memory_space<vmem>>, vector<32x4xf32>,
    %c5_i32 = arith.constant 5 : i32
    %84 = arith.addi %13, %c5_i32 : i32
    %85 = arith.index_cast %84 : i32 to index
    %86 = memref.load %arg1[%85] : memref<8xi32, #tpu.memory_space<smem>>
    %87 = arith.index_cast %86 : i32 to index
    %c0_41 = arith.constant 0 : index
    %c0_42 = arith.constant 0 : index
    %88 = vector.load %arg7[%87, %c0_41, %c0_42] : memref<6x32x4xf32, #tpu.memory_space<vmem>>, vector<1x32x4xf32>
    %89 = vector.shape_cast %88 : vector<1x32x4xf32> to vector<32x4xf32>
    %90 = arith.index_cast %86 : i32 to index
    %c0_43 = arith.constant 0 : index
    %c0_44 = arith.constant 0 : index
    %91 = vector.load %arg8[%90, %c0_43, %c0_44] : memref<6x1x4xf32, #tpu.memory_space<vmem>>, vector<1x1x4xf32>
    %92 = vector.shape_cast %91 : vector<1x1x4xf32> to vector<1x4xf32>
    %93 = vector.extract_strided_slice %12 {offsets = [160, 0], sizes = [32, 32], strides = [1, 1]} : vector<256x32xf32> to vector<32x32xf32>
    %cst_45 = arith.constant dense<0.000000e+00> : vector<32x4xf32>
    %94 = tpu.matmul %93, %89, %cst_45 {dimension_numbers = #tpu.dot_dimension_numbers<[1], [0], [0], [1], [0, 0, 1, 1], [], []>} : vector<32x32xf32>, vector<32x4xf32>, vector<32x4xf32> -> vector<32x4xf32>
    %95 = vector.broadcast %92 : vector<1x4xf32> to vector<32x4xf32>
    %96 = arith.addf %94, %95 : vector<32x4xf32>
    %c160 = arith.constant 160 : index
    %c0_46 = arith.constant 0 : index
    %97 = vector.load %arg9[%c160, %c0_46] : memref<256x4xf32, #tpu.memory_space<vmem>>, vector<32x4xf32>
    tpu.vector_store %arg9[%c160, %c0_46], %96 {strides = array<i32>} : memref<256x4xf32, #tpu.memory_space<vmem>>, vector<32x4xf32>,
    %c6_i32 = arith.constant 6 : i32
    %98 = arith.addi %13, %c6_i32 : i32
    %99 = arith.index_cast %98 : i32 to index
    %100 = memref.load %arg1[%99] : memref<8xi32, #tpu.memory_space<smem>>
    %101 = arith.index_cast %100 : i32 to index
    %c0_47 = arith.constant 0 : index
    %c0_48 = arith.constant 0 : index
    %102 = vector.load %arg7[%101, %c0_47, %c0_48] : memref<6x32x4xf32, #tpu.memory_space<vmem>>, vector<1x32x4xf32>
    %103 = vector.shape_cast %102 : vector<1x32x4xf32> to vector<32x4xf32>
    %104 = arith.index_cast %100 : i32 to index
    %c0_49 = arith.constant 0 : index
    %c0_50 = arith.constant 0 : index
    %105 = vector.load %arg8[%104, %c0_49, %c0_50] : memref<6x1x4xf32, #tpu.memory_space<vmem>>, vector<1x1x4xf32>
    %106 = vector.shape_cast %105 : vector<1x1x4xf32> to vector<1x4xf32>
    %107 = vector.extract_strided_slice %12 {offsets = [192, 0], sizes = [32, 32], strides = [1, 1]} : vector<256x32xf32> to vector<32x32xf32>
    %cst_51 = arith.constant dense<0.000000e+00> : vector<32x4xf32>
    %108 = tpu.matmul %107, %103, %cst_51 {dimension_numbers = #tpu.dot_dimension_numbers<[1], [0], [0], [1], [0, 0, 1, 1], [], []>} : vector<32x32xf32>, vector<32x4xf32>, vector<32x4xf32> -> vector<32x4xf32>
    %109 = vector.broadcast %106 : vector<1x4xf32> to vector<32x4xf32>
    %110 = arith.addf %108, %109 : vector<32x4xf32>
    %c192 = arith.constant 192 : index
    %c0_52 = arith.constant 0 : index
    %111 = vector.load %arg9[%c192, %c0_52] : memref<256x4xf32, #tpu.memory_space<vmem>>, vector<32x4xf32>
    tpu.vector_store %arg9[%c192, %c0_52], %110 {strides = array<i32>} : memref<256x4xf32, #tpu.memory_space<vmem>>, vector<32x4xf32>,
    %c7_i32 = arith.constant 7 : i32
    %112 = arith.addi %13, %c7_i32 : i32
    %113 = arith.index_cast %112 : i32 to index
    %114 = memref.load %arg1[%113] : memref<8xi32, #tpu.memory_space<smem>>
    %115 = arith.index_cast %114 : i32 to index
    %c0_53 = arith.constant 0 : index
    %c0_54 = arith.constant 0 : index
    %116 = vector.load %arg7[%115, %c0_53, %c0_54] : memref<6x32x4xf32, #tpu.memory_space<vmem>>, vector<1x32x4xf32>
    %117 = vector.shape_cast %116 : vector<1x32x4xf32> to vector<32x4xf32>
    %118 = arith.index_cast %114 : i32 to index
    %c0_55 = arith.constant 0 : index
    %c0_56 = arith.constant 0 : index
    %119 = vector.load %arg8[%118, %c0_55, %c0_56] : memref<6x1x4xf32, #tpu.memory_space<vmem>>, vector<1x1x4xf32>
    %120 = vector.shape_cast %119 : vector<1x1x4xf32> to vector<1x4xf32>
    %121 = vector.extract_strided_slice %12 {offsets = [224, 0], sizes = [32, 32], strides = [1, 1]} : vector<256x32xf32> to vector<32x32xf32>
    %cst_57 = arith.constant dense<0.000000e+00> : vector<32x4xf32>
    %122 = tpu.matmul %121, %117, %cst_57 {dimension_numbers = #tpu.dot_dimension_numbers<[1], [0], [0], [1], [0, 0, 1, 1], [], []>} : vector<32x32xf32>, vector<32x4xf32>, vector<32x4xf32> -> vector<32x4xf32>
    %123 = vector.broadcast %120 : vector<1x4xf32> to vector<32x4xf32>
    %124 = arith.addf %122, %123 : vector<32x4xf32>
    %c224 = arith.constant 224 : index
    %c0_58 = arith.constant 0 : index
    %125 = vector.load %arg9[%c224, %c0_58] : memref<256x4xf32, #tpu.memory_space<vmem>>, vector<32x4xf32>
    tpu.vector_store %arg9[%c224, %c0_58], %124 {strides = array<i32>} : memref<256x4xf32, #tpu.memory_space<vmem>>, vector<32x4xf32>,
    return
  }
  func.func @transform_0(%arg0: i32, %arg1: memref<8xi32, #tpu.memory_space<smem>>) -> (i32, i32) {
    %c0_i32 = arith.constant 0 : i32
    %c0_i32_0 = arith.constant 0 : i32
    return %arg0, %c0_i32 : i32, i32
  }
  func.func @transform_1(%arg0: i32, %arg1: memref<8xi32, #tpu.memory_space<smem>>) -> (i32, i32) {
    %c0_i32 = arith.constant 0 : i32
    %c0_i32_0 = arith.constant 0 : i32
    %c0_i32_1 = arith.constant 0 : i32
    return %c0_i32, %c0_i32_0 : i32, i32
  }
  func.func @transform_2(%arg0: i32, %arg1: memref<8xi32, #tpu.memory_space<smem>>) -> (i32, i32) {
    %c0_i32 = arith.constant 0 : i32
    %c0_i32_0 = arith.constant 0 : i32
    %c0_i32_1 = arith.constant 0 : i32
    return %c0_i32, %c0_i32_0 : i32, i32
  }
  func.func @transform_3(%arg0: i32, %arg1: memref<8xi32, #tpu.memory_space<smem>>) -> (i32, i32) {
    %c0_i32 = arith.constant 0 : i32
    %c0_i32_0 = arith.constant 0 : i32
    %c0_i32_1 = arith.constant 0 : i32
    return %c0_i32, %c0_i32_0 : i32, i32
  }
  func.func @transform_4(%arg0: i32, %arg1: memref<8xi32, #tpu.memory_space<smem>>) -> (i32, i32) {
    %c0_i32 = arith.constant 0 : i32
    %c0_i32_0 = arith.constant 0 : i32
    %c0_i32_1 = arith.constant 0 : i32
    return %c0_i32, %c0_i32_0 : i32, i32
  }
  func.func @transform_5(%arg0: i32, %arg1: memref<8xi32, #tpu.memory_space<smem>>) -> (i32, i32, i32) {
    %c0_i32 = arith.constant 0 : i32
    %c0_i32_0 = arith.constant 0 : i32
    %c0_i32_1 = arith.constant 0 : i32
    %c0_i32_2 = arith.constant 0 : i32
    return %c0_i32, %c0_i32_0, %c0_i32_1 : i32, i32, i32
  }
  func.func @transform_6(%arg0: i32, %arg1: memref<8xi32, #tpu.memory_space<smem>>) -> (i32, i32, i32) {
    %c0_i32 = arith.constant 0 : i32
    %c0_i32_0 = arith.constant 0 : i32
    %c0_i32_1 = arith.constant 0 : i32
    %c0_i32_2 = arith.constant 0 : i32
    return %c0_i32, %c0_i32_0, %c0_i32_1 : i32, i32, i32
  }
  func.func @transform_7(%arg0: i32, %arg1: memref<8xi32, #tpu.memory_space<smem>>) -> (i32, i32) {
    %c0_i32 = arith.constant 0 : i32
    %c0_i32_0 = arith.constant 0 : i32
    return %arg0, %c0_i32 : i32, i32
  }
}

</mosaic_0001>

<bundles_post_ra>
// kernel: tpu_custom_call.1
= control target key start
LH: loop header
LB: loop body
LE: loop exit
PB: predicated region body
PF: predicated region fallthrough
CT: control target
= control target key end

     0   :  { %s3045_s0 = inlined_call_operand.vmem [shape: s32[8], index: 0, kind: input, shape index: {}]   ;;  %s3046_s1 = inlined_call_operand.vmem [shape: f32[256,16], index: 1, kind: input, shape index: {}]   ;;  %s3047_s2 = inlined_call_operand.vmem [shape: f32[16,32], index: 2, kind: input, shape index: {}]   ;;  %s3048_s3 = inlined_call_operand.vmem [shape: f32[1,32], index: 3, kind: input, shape index: {}]   ;;  %s3049_s4 = inlined_call_operand.vmem [shape: f32[32,32], index: 4, kind: input, shape index: {}]   ;;  %s3050_s5 = inlined_call_operand.vmem [shape: f32[1,32], index: 5, kind: input, shape index: {}]   ;;  %s3051_s6 = inlined_call_operand.vmem [shape: f32[6,32,4], index: 6, kind: input, shape index: {}]   ;;  %s3052_s7 = inlined_call_operand.vmem [shape: f32[6,1,4], index: 7, kind: input, shape index: {}]   ;;  %s3053_s8 = inlined_call_operand.vmem [shape: f32[256,4], index: 8, kind: output, shape index: {}]  }
   0x1   :  { %s13_s29 = sshll.u32 %s3045_s0, 4  ;;  %s14_s29 = int_to_ptr.vmem [resolvable:$true] %s13_s29 }
   0x2   :  { %s2438_s30 = scalar_lea.vmem %s14_s29, 16  ;;  %p2443_p1 = scmp.lt.s32.totalorder %s14_s29, %s14_s29 }
   0x3   :  { %p2439_p0 = scmp.ne.s32.totalorder %s14_s29, %s2438_s30  ;;  %p2444_p2 = scmp.lt.s32.totalorder %s2438_s30, %s2438_s30 }
   0x5   :  { %p2445_p3 = por %p2444_p2, %p2443_p1 }
   0x7   :  { %p2446_p4 = pnand %p2445_p3, %p2439_p0 }
   0x9   :  { %2449 = shalt.err (!%p2446_p4)  }
   0xa   :  { %s2452_s9 = smov [#allocation3]  }
   0xb   :  { %16 = dma.vmem_to_smem %s14_s29, 16, %s2452_s9, [#allocation2] }
   0xc   :  { %2450 = dma.done.wait [#allocation2], 16 }
   0xd   :  { %2451 = vsyncadd [#allocation2], 4294967280 }
   0xe   :  { %18 = sfence }
   0xf   :  { %v65_v0 = vld [vmem:[%s3047_s2] sm:$0xff]  ;;  %v66_v1 = vld [vmem:[%s3047_s2 + $0x8] sm:$0xff]  ;;  %vm74_vm0 = vcmask 130048   ;;  %v35_v5 = vld [vmem:[%s3046_s1 + $0x10] sm:$0xff]  ;;  %s2649_s0 = sld [smem:[#allocation3 + $0x1]]  ;;  %vm439_vm1 = vcmask 261120  }
  0x10   :  { %v33_v2 = vld [vmem:[%s3046_s1] sm:$0xff]  ;;  %v2233_v3 = vpack.c.bf16 %v66_v1, %v65_v0  ;;  %v34_v4 = vld [vmem:[%s3046_s1 + $0x8] sm:$0xff]  ;;  %v36_v6 = vld [vmem:[%s3046_s1 + $0x18] sm:$0xff]  ;;  %s2750_s26 = sld [smem:[#allocation3 + $0x3]]  ;;  %s2769_s11 = sld [smem:[#allocation3 + $0x4]]  ;;  %vm906_vm2 = vcmask 31744  }
  0x11   :  { %2017 = vmatprep.mubr.msk.f32.mxu0 %vm74_vm0, %v33_v2  ;;  %v37_v7 = vld [vmem:[%s3046_s1 + $0x20] sm:$0xff]  ;;  %v38_v8 = vld [vmem:[%s3046_s1 + $0x28] sm:$0xff]  ;;  %v39_v9 = vld [vmem:[%s3046_s1 + $0x30] sm:$0xff]  ;;  %s2776_s12 = sld [smem:[#allocation3 + $0x5]]  ;;  %s2794_s17 = sld [smem:[#allocation3 + $0x6]] }
  0x12   :  { %2234 = vmatprep.subr.bf16.mxu0 %v2233_v3  ;;  %v40_v10 = vld [vmem:[%s3046_s1 + $0x38] sm:$0xff]  ;;  %v41_v11 = vld [vmem:[%s3046_s1 + $0x40] sm:$0xff]  ;;  %v42_v12 = vld [vmem:[%s3046_s1 + $0x48] sm:$0xff]  ;;  %s2815_s20 = sld [smem:[#allocation3 + $0x7]] }
  0x13   :  { %2236 = vmatpush3.bf16.msra.mxu0 %v2233_v3  ;;  %v43_v13 = vld [vmem:[%s3046_s1 + $0x50] sm:$0xff]  ;;  %v44_v14 = vld [vmem:[%s3046_s1 + $0x58] sm:$0xff]  ;;  %v45_v15 = vld [vmem:[%s3046_s1 + $0x60] sm:$0xff] }
  0x14   :  { %v46_v16 = vld [vmem:[%s3046_s1 + $0x68] sm:$0xff]  ;;  %v47_v17 = vld [vmem:[%s3046_s1 + $0x70] sm:$0xff]  ;;  %v48_v18 = vld [vmem:[%s3046_s1 + $0x78] sm:$0xff] }
  0x15   :  { %v49_v19 = vld [vmem:[%s3046_s1 + $0x80] sm:$0xff]  ;;  %v50_v20 = vld [vmem:[%s3046_s1 + $0x88] sm:$0xff]  ;;  %v51_v21 = vld [vmem:[%s3046_s1 + $0x90] sm:$0xff]  ;;  %s1831_s15 = sshll.u32 %s2649_s0, 5 }
  0x16   :  { %2018 = vmatmul.mubr.msk.f32.vlgmr.msra.gmra.mrb[0].mxu0 %vm74_vm0, %v34_v4  ;;  %v52_v22 = vld [vmem:[%s3046_s1 + $0x98] sm:$0xff]  ;;  %v53_v23 = vld [vmem:[%s3046_s1 + $0xa0] sm:$0xff]  ;;  %v54_v24 = vld [vmem:[%s3046_s1 + $0xa8] sm:$0xff]  ;;  %s1845_s27 = sshll.u32 %s2750_s26, 5 }
  0x17   :  { %2020 = vmatprep.mubr.msk.f32.mxu0 %vm74_vm0, %v35_v5  ;;  %v55_v25 = vld [vmem:[%s3046_s1 + $0xb0] sm:$0xff]  ;;  %v56_v26 = vld [vmem:[%s3046_s1 + $0xb8] sm:$0xff]  ;;  %v57_v27 = vld [vmem:[%s3046_s1 + $0xc0] sm:$0xff]  ;;  %s2756_s30 = scalar_lea.vmem %s3051_s6, %s1845_s27  ;;  %s1859_s16 = sshll.u32 %s2776_s12, 5 }
  0x18   :  { %v58_v28 = vld [vmem:[%s3046_s1 + $0xc8] sm:$0xff]  ;;  %v59_v29 = vld [vmem:[%s3046_s1 + $0xd0] sm:$0xff]  ;;  %v60_v30 = vld [vmem:[%s3046_s1 + $0xd8] sm:$0xff]  ;;  %s2804_s19 = scalar_lea.vmem %s3051_s6, %s1859_s16  ;;  %s1873_s24 = sshll.u32 %s2815_s20, 5 }
  0x19   :  { %v61_v31 = vld [vmem:[%s3046_s1 + $0xe0] sm:$0xff]  ;;  %v62_v32 = vld [vmem:[%s3046_s1 + $0xe8] sm:$0xff]  ;;  %v63_v33 = vld [vmem:[%s3046_s1 + $0xf0] sm:$0xff]  ;;  %s2843_s28 = scalar_lea.vmem %s3051_s6, %s1873_s24 }
  0x1a   :  { %2021 = vmatmul.mubr.msk.f32.gmra.mrb[2].mxu0 %vm74_vm0, %v36_v6  ;;  %v64_v34 = vld [vmem:[%s3046_s1 + $0xf8] sm:$0xff]  ;;  %v428_v35 = vld [vmem:[%s3049_s4] sm:$0xff]  ;;  %v429_v36 = vld [vmem:[%s3049_s4 + $0x8] sm:$0xff]  ;;  %s2647_s1 = sld [smem:[#allocation3]] }
  0x1b   :  { %2023 = vmatprep.mubr.msk.f32.mxu0 %vm74_vm0, %v37_v7  ;;  %v2237_v37 = vpack.c.bf16 %v429_v36, %v428_v35  ;;  %v430_v38 = vld [vmem:[%s3049_s4 + $0x10] sm:$0xff]  ;;  %v431_v39 = vld [vmem:[%s3049_s4 + $0x18] sm:$0xff]  ;;  %s2661_s4 = scalar_lea.vmem %s3051_s6, %s1831_s15  ;;  %v2670_v47 = vld [vmem:[%s3048_s3] ss:$0 sm:$0xff]  ;;  %s2738_s3 = sld [smem:[#allocation3 + $0x2]] }
  0x1c   :  { %v2241_v40 = vpack.c.bf16 %v431_v39, %v430_v38  ;;  %v915_v43 = vld [vmem:[%s2661_s4] sm:$0xff]  ;;  %v916_v45 = vld [vmem:[%s2661_s4 + $0x8] sm:$0xff] }
  0x1d   :  { %2238 = vmatprep.subr.bf16.mxu1 %v2237_v37  ;;  %v2253_v46 = vpack.c.bf16 %v916_v45, %v915_v43 }
  0x1e   :  { %2024 = vmatmul.mubr.msk.f32.gmra.mrb[4].mxu0 %vm74_vm0, %v38_v8  ;;  %2240 = vmatpush3.bf16.msra.mxu1 %v2237_v37 }
  0x1f   :  { %2026 = vmatprep.mubr.msk.f32.mxu0 %vm74_vm0, %v39_v9  ;;  %2242 = vmatprep.subr.bf16.mxu1 %v2241_v40 }
  0x20   :  { %s1824_s14 = sshll.u32 %s2647_s1, 5 }
  0x21   :  { %s2656_s18 = scalar_lea.vmem %s3051_s6, %s1824_s14  ;;  %s1838_s22 = sshll.u32 %s2738_s3, 5 }
  0x22   :  { %2027 = vmatmul.mubr.msk.f32.gmra.mrb[6].mxu0 %vm74_vm0, %v40_v10  ;;  %2244 = vmatpush3.bf16.msra.mxu1 %v2241_v40  ;;  %v797_v41 = vld [vmem:[%s2656_s18] sm:$0xff]  ;;  %v798_v42 = vld [vmem:[%s2656_s18 + $0x8] sm:$0xff]  ;;  %s2746_s25 = scalar_lea.vmem %s3051_s6, %s1838_s22  ;;  %s919_s14 = scalar_lea.vmem %s3052_s7, %s2649_s0 }
  0x23   :  { %2029 = vmatprep.mubr.msk.f32.mxu0 %vm74_vm0, %v41_v11  ;;  %v2245_v44 = vpack.c.bf16 %v798_v42, %v797_v41  ;;  %2254 = vmatprep.subr.bf16.mxu1 %v2253_v46 }
  0x25   :  { %2246 = vmatprep.subr.bf16.mxu0 %v2245_v44 }
  0x26   :  { %2030 = vmatmul.mubr.msk.f32.gmra.mrb[8].mxu0 %vm74_vm0, %v42_v12 }
  0x27   :  { %2032 = vmatprep.mubr.msk.f32.mxu0 %vm74_vm0, %v43_v13  ;;  %2248 = vmatpush3.bf16.msra.mxu0 %v2245_v44 }
  0x2a   :  { %2033 = vmatmul.mubr.msk.f32.gmra.mrb[10].mxu0 %vm74_vm0, %v44_v14 }
  0x2b   :  { %2035 = vmatprep.mubr.msk.f32.mxu0 %vm74_vm0, %v45_v15 }
  0x2e   :  { %2036 = vmatmul.mubr.msk.f32.gmra.mrb[12].mxu0 %vm74_vm0, %v46_v16 }
  0x2f   :  { %2038 = vmatprep.mubr.msk.f32.mxu0 %vm74_vm0, %v47_v17 }
  0x32   :  { %2039 = vmatmul.mubr.msk.f32.gmra.mrb[14].mxu0 %vm74_vm0, %v48_v18 }
  0x33   :  { %2041 = vmatprep.mubr.msk.f32.mxu0 %vm74_vm0, %v49_v19 }
  0x36   :  { %2042 = vmatmul.mubr.msk.f32.gmra.mrb[16].mxu0 %vm74_vm0, %v50_v20 }
  0x37   :  { %2044 = vmatprep.mubr.msk.f32.mxu0 %vm74_vm0, %v51_v21 }
  0x3a   :  { %2045 = vmatmul.mubr.msk.f32.gmra.mrb[18].mxu0 %vm74_vm0, %v52_v22 }
  0x3b   :  { %2047 = vmatprep.mubr.msk.f32.mxu0 %vm74_vm0, %v53_v23 }
  0x3e   :  { %2048 = vmatmul.mubr.msk.f32.gmra.mrb[20].mxu0 %vm74_vm0, %v54_v24 }
  0x3f   :  { %2050 = vmatprep.mubr.msk.f32.mxu0 %vm74_vm0, %v55_v25 }
  0x42   :  { %2051 = vmatmul.mubr.msk.f32.gmra.mrb[22].mxu0 %vm74_vm0, %v56_v26 }
  0x43   :  { %2053 = vmatprep.mubr.msk.f32.mxu0 %vm74_vm0, %v57_v27 }
  0x46   :  { %2054 = vmatmul.mubr.msk.f32.gmra.mrb[24].mxu0 %vm74_vm0, %v58_v28 }
  0x47   :  { %2056 = vmatprep.mubr.msk.f32.mxu0 %vm74_vm0, %v59_v29 }
  0x4a   :  { %2057 = vmatmul.mubr.msk.f32.gmra.mrb[26].mxu0 %vm74_vm0, %v60_v30 }
  0x4b   :  { %2059 = vmatprep.mubr.msk.f32.mxu0 %vm74_vm0, %v61_v31 }
  0x4e   :  { %2060 = vmatmul.mubr.msk.f32.gmra.mrb[28].mxu0 %vm74_vm0, %v62_v32 }
  0x4f   :  { %2062 = vmatprep.mubr.msk.f32.mxu0 %vm74_vm0, %v63_v33 }
  0x52   :  { %2063 = vmatmul.mubr.msk.f32.gmra.mrb[30].mxu0 %vm74_vm0, %v64_v34 }
  0xe9   :  { %v2019_v48 = vpop.f32.mrb[0].mxu0 }
  0xea   :  { %v243_v49 = vadd.f32 %v2019_v48, %v2670_v47  ;;  %v237_v50 = vpop.f32.mrb[1].mxu0 }
  0xeb   :  { %v238_v51 = vadd.f32 %v2670_v47, %v237_v50 }
  0xed   :  { %2310 = vtanh.f32 %v238_v51  ;;  %v2022_v52 = vpop.f32.mrb[2].mxu0 }
  0xee   :  { %2312 = vtanh.f32 %v243_v49  ;;  %v253_v53 = vadd.f32 %v2022_v52, %v2670_v47  ;;  %v247_v54 = vpop.f32.mrb[3].mxu0 }
  0xef   :  { %v248_v55 = vadd.f32 %v2670_v47, %v247_v54 }
  0xf1   :  { %2314 = vtanh.f32 %v248_v55  ;;  %v2025_v56 = vpop.f32.mrb[4].mxu0 }
  0xf2   :  { %2316 = vtanh.f32 %v253_v53  ;;  %v263_v57 = vadd.f32 %v2025_v56, %v2670_v47  ;;  %v257_v58 = vpop.f32.mrb[5].mxu0 }
  0xf3   :  { %v258_v59 = vadd.f32 %v2670_v47, %v257_v58 }
  0xf5   :  { %2318 = vtanh.f32 %v258_v59  ;;  %v2028_v60 = vpop.f32.mrb[6].mxu0 }
  0xf6   :  { %2320 = vtanh.f32 %v263_v57  ;;  %v273_v61 = vadd.f32 %v2028_v60, %v2670_v47  ;;  %v267_v62 = vpop.f32.mrb[7].mxu0 }
  0xf7   :  { %v2311_v63 = vpop.eup %2310  ;;  %v268_v0 = vadd.f32 %v2670_v47, %v267_v62 }
  0xf8   :  { %v2313_v1 = vpop.eup %2312  ;;  %2073 = vmatprep.mubr.msk.f32.mxu1 %vm439_vm1, %v2311_v63 }
  0xf9   :  { %2322 = vtanh.f32 %v268_v0  ;;  %v2031_v2 = vpop.f32.mrb[8].mxu0  ;;  %2074 = vmatmul.mubr.msk.f32.vlgmr.msra.gmra.mrb[0].mxu1 %vm439_vm1, %v2313_v1 }
  0xfa   :  { %2324 = vtanh.f32 %v273_v61  ;;  %v283_v3 = vadd.f32 %v2031_v2, %v2670_v47  ;;  %v277_v4 = vpop.f32.mrb[9].mxu0  ;;  %2256 = vmatpush3.bf16.msra.mxu1 %v2253_v46 }
  0xfb   :  { %v2315_v5 = vpop.eup %2314  ;;  %v278_v6 = vadd.f32 %v2670_v47, %v277_v4 }
  0xfc   :  { %v2317_v7 = vpop.eup %2316  ;;  %2076 = vmatprep.mubr.msk.f32.mxu1 %vm439_vm1, %v2315_v5 }
  0xfd   :  { %2326 = vtanh.f32 %v278_v6  ;;  %v2034_v8 = vpop.f32.mrb[10].mxu0  ;;  %2077 = vmatmul.mubr.msk.f32.gmra.mrb[2].mxu1 %vm439_vm1, %v2317_v7 }
  0xfe   :  { %2328 = vtanh.f32 %v283_v3  ;;  %v293_v9 = vadd.f32 %v2034_v8, %v2670_v47  ;;  %v287_v10 = vpop.f32.mrb[11].mxu0 }
  0xff   :  { %v2319_v11 = vpop.eup %2318  ;;  %v288_v12 = vadd.f32 %v2670_v47, %v287_v10 }
 0x100   :  { %v2321_v13 = vpop.eup %2320  ;;  %2079 = vmatprep.mubr.msk.f32.mxu1 %vm439_vm1, %v2319_v11 }
 0x101   :  { %2330 = vtanh.f32 %v288_v12  ;;  %v2037_v14 = vpop.f32.mrb[12].mxu0  ;;  %2080 = vmatmul.mubr.msk.f32.gmra.mrb[4].mxu1 %vm439_vm1, %v2321_v13 }
 0x102   :  { %2332 = vtanh.f32 %v293_v9  ;;  %v303_v15 = vadd.f32 %v2037_v14, %v2670_v47  ;;  %v297_v16 = vpop.f32.mrb[13].mxu0 }
 0x103   :  { %v2323_v17 = vpop.eup %2322  ;;  %v298_v18 = vadd.f32 %v2670_v47, %v297_v16  ;;  %v799_v16 = vld [vmem:[%s2656_s18 + $0x10] sm:$0xff] }
 0x104   :  { %v2325_v19 = vpop.eup %2324  ;;  %2082 = vmatprep.mubr.msk.f32.mxu1 %vm439_vm1, %v2323_v17  ;;  %v800_v17 = vld [vmem:[%s2656_s18 + $0x18] sm:$0xff]  ;;  %s1504_s18 = scalar_lea.vmem %s3052_s7, %s2794_s17 }
 0x105   :  { %2334 = vtanh.f32 %v298_v18  ;;  %v2040_v20 = vpop.f32.mrb[14].mxu0  ;;  %2083 = vmatmul.mubr.msk.f32.gmra.mrb[6].mxu1 %vm439_vm1, %v2325_v19  ;;  %v2249_v18 = vpack.c.bf16 %v800_v17, %v799_v16  ;;  %v917_v19 = vld [vmem:[%s2661_s4 + $0x10] sm:$0xff] }
 0x106   :  { %2336 = vtanh.f32 %v303_v15  ;;  %v313_v21 = vadd.f32 %v2040_v20, %v2670_v47  ;;  %v307_v22 = vpop.f32.mrb[15].mxu0  ;;  %v918_v20 = vld [vmem:[%s2661_s4 + $0x18] sm:$0xff]  ;;  %s1866_s4 = sshll.u32 %s2794_s17, 5 }
 0x107   :  { %v2327_v23 = vpop.eup %2326  ;;  %v308_v24 = vadd.f32 %v2670_v47, %v307_v22  ;;  %2250 = vmatprep.subr.bf16.mxu0 %v2249_v18  ;;  %v1032_v22 = vld [vmem:[%s2746_s25] sm:$0xff]  ;;  %s2825_s23 = scalar_lea.vmem %s3051_s6, %s1866_s4  ;;  %s1270_s4 = scalar_lea.vmem %s3052_s7, %s2769_s11 }
 0x108   :  { %v2329_v25 = vpop.eup %2328  ;;  %2085 = vmatprep.mubr.msk.f32.mxu1 %vm439_vm1, %v2327_v23  ;;  %2252 = vmatpush3.bf16.msra.mxu0 %v2249_v18  ;;  %v1033_v23 = vld [vmem:[%s2746_s25 + $0x8] sm:$0xff] }
 0x109   :  { %2338 = vtanh.f32 %v308_v24  ;;  %v2043_v26 = vpop.f32.mrb[16].mxu0  ;;  %2086 = vmatmul.mubr.msk.f32.gmra.mrb[8].mxu1 %vm439_vm1, %v2329_v25  ;;  %v2261_v24 = vpack.c.bf16 %v1033_v23, %v1032_v22  ;;  %v1149_v25 = vld [vmem:[%s2756_s30] sm:$0xff]  ;;  %v1501_v23 = vld [vmem:[%s2825_s23 + $0x8] sm:$0xff] }
 0x10a   :  { %2340 = vtanh.f32 %v313_v21  ;;  %v323_v27 = vadd.f32 %v2043_v26, %v2670_v47  ;;  %v317_v28 = vpop.f32.mrb[17].mxu0  ;;  %v2257_v21 = vpack.c.bf16 %v918_v20, %v917_v19  ;;  %v1150_v26 = vld [vmem:[%s2756_s30 + $0x8] sm:$0xff]  ;;  %v1500_v22 = vld [vmem:[%s2825_s23] sm:$0xff] }
 0x10b   :  { %v2331_v29 = vpop.eup %2330  ;;  %v318_v30 = vadd.f32 %v2670_v47, %v317_v28  ;;  %2262 = vmatprep.subr.bf16.mxu0 %v2261_v24  ;;  %v2766_v28 = vld [vmem:[%s3050_s5] ss:$0 sm:$0xff]  ;;  %s1852_s5 = sshll.u32 %s2769_s11, 5 }
 0x10c   :  { %v2333_v31 = vpop.eup %2332  ;;  %2088 = vmatprep.mubr.msk.f32.mxu1 %vm439_vm1, %v2331_v29  ;;  %2258 = vmatprep.subr.bf16.mxu1 %v2257_v21  ;;  %s2784_s15 = scalar_lea.vmem %s3051_s6, %s1852_s5  ;;  %s1153_s5 = scalar_lea.vmem %s3052_s7, %s2750_s26 }
 0x10d   :  { %2342 = vtanh.f32 %v318_v30  ;;  %v2046_v32 = vpop.f32.mrb[18].mxu0  ;;  %2089 = vmatmul.mubr.msk.f32.gmra.mrb[10].mxu1 %vm439_vm1, %v2333_v31 }
 0x10e   :  { %2344 = vtanh.f32 %v323_v27  ;;  %v333_v33 = vadd.f32 %v2046_v32, %v2670_v47  ;;  %v327_v34 = vpop.f32.mrb[19].mxu0  ;;  %2260 = vmatpush3.bf16.msra.mxu1 %v2257_v21  ;;  %v2760_v27 = vpack.c.bf16 %v1150_v26, %v1149_v25 }
 0x10f   :  { %v2335_v35 = vpop.eup %2334  ;;  %v328_v36 = vadd.f32 %v2670_v47, %v327_v34 }
 0x110   :  { %v2337_v37 = vpop.eup %2336  ;;  %2091 = vmatprep.mubr.msk.f32.mxu1 %vm439_vm1, %v2335_v35  ;;  %2270 = vmatprep.subr.bf16.mxu1 %v2760_v27 }
 0x111   :  { %2346 = vtanh.f32 %v328_v36  ;;  %v2049_v38 = vpop.f32.mrb[20].mxu0  ;;  %2092 = vmatmul.mubr.msk.f32.gmra.mrb[12].mxu1 %vm439_vm1, %v2337_v37 }
 0x112   :  { %2348 = vtanh.f32 %v333_v33  ;;  %v343_v39 = vadd.f32 %v2049_v38, %v2670_v47  ;;  %v337_v40 = vpop.f32.mrb[21].mxu0 }
 0x113   :  { %v2339_v41 = vpop.eup %2338  ;;  %v338_v42 = vadd.f32 %v2670_v47, %v337_v40 }
 0x114   :  { %v2341_v43 = vpop.eup %2340  ;;  %2094 = vmatprep.mubr.msk.f32.mxu1 %vm439_vm1, %v2339_v41  ;;  %v1034_v41 = vld [vmem:[%s2746_s25 + $0x10] sm:$0xff] }
 0x115   :  { %2350 = vtanh.f32 %v338_v42  ;;  %v2052_v44 = vpop.f32.mrb[22].mxu0  ;;  %2095 = vmatmul.mubr.msk.f32.gmra.mrb[14].mxu1 %vm439_vm1, %v2341_v43  ;;  %v1035_v42 = vld [vmem:[%s2746_s25 + $0x18] sm:$0xff]  ;;  %s1621_s25 = scalar_lea.vmem %s3052_s7, %s2815_s20 }
 0x116   :  { %2352 = vtanh.f32 %v343_v39  ;;  %v353_v45 = vadd.f32 %v2052_v44, %v2670_v47  ;;  %v347_v46 = vpop.f32.mrb[23].mxu0 }
 0x117   :  { %v2343_v48 = vpop.eup %2342  ;;  %v348_v49 = vadd.f32 %v2670_v47, %v347_v46 }
 0x118   :  { %v2345_v50 = vpop.eup %2344  ;;  %2097 = vmatprep.mubr.msk.f32.mxu1 %vm439_vm1, %v2343_v48 }
 0x119   :  { %2354 = vtanh.f32 %v348_v49  ;;  %v2055_v51 = vpop.f32.mrb[24].mxu0  ;;  %2098 = vmatmul.mubr.msk.f32.gmra.mrb[16].mxu1 %vm439_vm1, %v2345_v50  ;;  %v2265_v49 = vpack.c.bf16 %v1035_v42, %v1034_v41  ;;  %v1617_v41 = vld [vmem:[%s2843_s28] sm:$0xff]  ;;  %v1618_v42 = vld [vmem:[%s2843_s28 + $0x8] sm:$0xff] }
 0x11a   :  { %2356 = vtanh.f32 %v353_v45  ;;  %v363_v52 = vadd.f32 %v2055_v51, %v2670_v47  ;;  %v357_v53 = vpop.f32.mrb[25].mxu0  ;;  %v1266_v51 = vld [vmem:[%s2784_s15] sm:$0xff] }
 0x11b   :  { %v2347_v54 = vpop.eup %2346  ;;  %v358_v55 = vadd.f32 %v2670_v47, %v357_v53 }
 0x11c   :  { %v2349_v56 = vpop.eup %2348  ;;  %2100 = vmatprep.mubr.msk.f32.mxu1 %vm439_vm1, %v2347_v54 }
 0x11d   :  { %2358 = vtanh.f32 %v358_v55  ;;  %v2058_v57 = vpop.f32.mrb[26].mxu0  ;;  %2101 = vmatmul.mubr.msk.f32.gmra.mrb[18].mxu1 %vm439_vm1, %v2349_v56 }
 0x11e   :  { %2360 = vtanh.f32 %v363_v52  ;;  %v373_v58 = vadd.f32 %v2058_v57, %v2670_v47  ;;  %v367_v59 = vpop.f32.mrb[27].mxu0  ;;  %v1267_v52 = vld [vmem:[%s2784_s15 + $0x8] sm:$0xff] }
 0x11f   :  { %v2351_v60 = vpop.eup %2350  ;;  %v368_v61 = vadd.f32 %v2670_v47, %v367_v59 }
 0x120   :  { %v2353_v62 = vpop.eup %2352  ;;  %2103 = vmatprep.mubr.msk.f32.mxu1 %vm439_vm1, %v2351_v60  ;;  %v1151_v60 = vld [vmem:[%s2756_s30 + $0x10] sm:$0xff] }
 0x121   :  { %2362 = vtanh.f32 %v368_v61  ;;  %v2061_v63 = vpop.f32.mrb[28].mxu0  ;;  %2104 = vmatmul.mubr.msk.f32.gmra.mrb[20].mxu1 %vm439_vm1, %v2353_v62  ;;  %v1152_v61 = vld [vmem:[%s2756_s30 + $0x18] sm:$0xff]  ;;  %s801_s30 = scalar_lea.vmem %s3052_s7, %s2647_s1 }
 0x122   :  { %2364 = vtanh.f32 %v373_v58  ;;  %v383_v0 = vadd.f32 %v2061_v63, %v2670_v47  ;;  %v377_v1 = vpop.f32.mrb[29].mxu0  ;;  %v2277_v58 = vpack.c.bf16 %v1267_v52, %v1266_v51  ;;  %v1502_v51 = vld [vmem:[%s2825_s23 + $0x10] sm:$0xff]  ;;  %v1503_v52 = vld [vmem:[%s2825_s23 + $0x18] sm:$0xff]  ;;  %s1036_s23 = scalar_lea.vmem %s3052_s7, %s2738_s3  ;;  %s1387_s3 = scalar_lea.vmem %s3052_s7, %s2776_s12 }
 0x123   :  { %v2355_v2 = vpop.eup %2354  ;;  %v378_v3 = vadd.f32 %v2670_v47, %v377_v1 }
 0x124   :  { %v2357_v4 = vpop.eup %2356  ;;  %2106 = vmatprep.mubr.msk.f32.mxu1 %vm439_vm1, %v2355_v2 }
 0x125   :  { %2366 = vtanh.f32 %v378_v3  ;;  %v2064_v5 = vpop.f32.mrb[30].mxu0  ;;  %2107 = vmatmul.mubr.msk.f32.gmra.mrb[22].mxu1 %vm439_vm1, %v2357_v4  ;;  %v2273_v3 = vpack.c.bf16 %v1152_v61, %v1151_v60 }
 0x126   :  { %2368 = vtanh.f32 %v383_v0  ;;  %v393_v6 = vadd.f32 %v2064_v5, %v2670_v47  ;;  %v387_v7 = vpop.f32.mrb[31].mxu0  ;;  %v1383_v5 = vld [vmem:[%s2804_s19] sm:$0xff] }
 0x127   :  { %v2359_v8 = vpop.eup %2358  ;;  %v388_v9 = vadd.f32 %v2670_v47, %v387_v7 }
 0x128   :  { %v2361_v10 = vpop.eup %2360  ;;  %2109 = vmatprep.mubr.msk.f32.mxu1 %vm439_vm1, %v2359_v8 }
 0x129   :  { %2370 = vtanh.f32 %v388_v9  ;;  %2110 = vmatmul.mubr.msk.f32.gmra.mrb[24].mxu1 %vm439_vm1, %v2361_v10 }
 0x12a   :  { %2372 = vtanh.f32 %v393_v6  ;;  %v1384_v6 = vld [vmem:[%s2804_s19 + $0x8] sm:$0xff] }
 0x12b   :  { %v2363_v11 = vpop.eup %2362 }
 0x12c   :  { %v2365_v12 = vpop.eup %2364  ;;  %2112 = vmatprep.mubr.msk.f32.mxu1 %vm439_vm1, %v2363_v11 }
 0x12d   :  { %2113 = vmatmul.mubr.msk.f32.gmra.mrb[26].mxu1 %vm439_vm1, %v2365_v12  ;;  %v2285_v12 = vpack.c.bf16 %v1384_v6, %v1383_v5 }
 0x12f   :  { %v2367_v13 = vpop.eup %2366 }
 0x130   :  { %v2369_v14 = vpop.eup %2368  ;;  %2115 = vmatprep.mubr.msk.f32.mxu1 %vm439_vm1, %v2367_v13 }
 0x131   :  { %2116 = vmatmul.mubr.msk.f32.gmra.mrb[28].mxu1 %vm439_vm1, %v2369_v14  ;;  %v1268_v14 = vld [vmem:[%s2784_s15 + $0x10] sm:$0xff] }
 0x133   :  { %v2371_v47 = vpop.eup %2370 }
 0x134   :  { %v2373_v15 = vpop.eup %2372  ;;  %2118 = vmatprep.mubr.msk.f32.mxu1 %vm439_vm1, %v2371_v47  ;;  %v1269_v47 = vld [vmem:[%s2784_s15 + $0x18] sm:$0xff] }
 0x135   :  { %2119 = vmatmul.mubr.msk.f32.gmra.mrb[30].mxu1 %vm439_vm1, %v2373_v15  ;;  %v2281_v20 = vpack.c.bf16 %v1269_v47, %v1268_v14 }
 0x1cc   :  { %v2075_v29 = vpop.f32.mrb[0].mxu1 }
 0x1cd   :  { %v608_v30 = vadd.f32 %v2075_v29, %v2766_v28  ;;  %v602_v31 = vpop.f32.mrb[1].mxu1 }
 0x1ce   :  { %v603_v32 = vadd.f32 %v2766_v28, %v602_v31 }
 0x1d0   :  { %2374 = vtanh.f32 %v603_v32  ;;  %v2078_v33 = vpop.f32.mrb[2].mxu1  ;;  %v1385_v32 = vld [vmem:[%s2804_s19 + $0x10] sm:$0xff] }
 0x1d1   :  { %2376 = vtanh.f32 %v608_v30  ;;  %v618_v34 = vadd.f32 %v2078_v33, %v2766_v28  ;;  %v612_v35 = vpop.f32.mrb[3].mxu1  ;;  %v2293_v30 = vpack.c.bf16 %v1501_v23, %v1500_v22  ;;  %v1386_v33 = vld [vmem:[%s2804_s19 + $0x18] sm:$0xff] }
 0x1d2   :  { %v613_v36 = vadd.f32 %v2766_v28, %v612_v35 }
 0x1d4   :  { %2378 = vtanh.f32 %v613_v36  ;;  %v2081_v37 = vpop.f32.mrb[4].mxu1 }
 0x1d5   :  { %2380 = vtanh.f32 %v618_v34  ;;  %v628_v38 = vadd.f32 %v2081_v37, %v2766_v28  ;;  %v622_v39 = vpop.f32.mrb[5].mxu1 }
 0x1d6   :  { %v623_v40 = vadd.f32 %v2766_v28, %v622_v39  ;;  %v2289_v39 = vpack.c.bf16 %v1386_v33, %v1385_v32 }
 0x1d8   :  { %2382 = vtanh.f32 %v623_v40  ;;  %v2084_v43 = vpop.f32.mrb[6].mxu1 }
 0x1d9   :  { %2384 = vtanh.f32 %v628_v38  ;;  %v638_v44 = vadd.f32 %v2084_v43, %v2766_v28  ;;  %v632_v45 = vpop.f32.mrb[7].mxu1 }
 0x1da   :  { %v2375_v46 = vpop.eup %2374  ;;  %v633_v48 = vadd.f32 %v2766_v28, %v632_v45 }
 0x1db   :  { %v2377_v50 = vpop.eup %2376  ;;  %2129 = vmatprep.mubr.msk.f32.mxu0 %vm439_vm1, %v2375_v46 }
 0x1dc   :  { %2386 = vtanh.f32 %v633_v48  ;;  %v2087_v53 = vpop.f32.mrb[8].mxu1  ;;  %2130 = vmatmul.mubr.msk.f32.vlgmr.msra.gmra.mrb[32].mxu0 %vm439_vm1, %v2377_v50 }
 0x1dd   :  { %2388 = vtanh.f32 %v638_v44  ;;  %v648_v54 = vadd.f32 %v2087_v53, %v2766_v28  ;;  %v642_v55 = vpop.f32.mrb[9].mxu1  ;;  %2264 = vmatpush3.bf16.msra.mxu0 %v2261_v24 }
 0x1de   :  { %v2379_v56 = vpop.eup %2378  ;;  %v643_v57 = vadd.f32 %v2766_v28, %v642_v55  ;;  %2266 = vmatprep.subr.bf16.mxu0 %v2265_v49 }
 0x1df   :  { %v2381_v59 = vpop.eup %2380  ;;  %2132 = vmatprep.mubr.msk.f32.mxu0 %vm439_vm1, %v2379_v56 }
 0x1e0   :  { %2390 = vtanh.f32 %v643_v57  ;;  %v2090_v62 = vpop.f32.mrb[10].mxu1  ;;  %2133 = vmatmul.mubr.msk.f32.gmra.mrb[34].mxu0 %vm439_vm1, %v2381_v59 }
 0x1e1   :  { %2392 = vtanh.f32 %v648_v54  ;;  %v658_v63 = vadd.f32 %v2090_v62, %v2766_v28  ;;  %v652_v0 = vpop.f32.mrb[11].mxu1  ;;  %2268 = vmatpush3.bf16.msra.mxu0 %v2265_v49  ;;  %v2301_v49 = vpack.c.bf16 %v1618_v42, %v1617_v41 }
 0x1e2   :  { %v2383_v1 = vpop.eup %2382  ;;  %v653_v2 = vadd.f32 %v2766_v28, %v652_v0  ;;  %2278 = vmatprep.subr.bf16.mxu0 %v2277_v58 }
 0x1e3   :  { %v2385_v4 = vpop.eup %2384  ;;  %2143 = vmatprep.mubr.msk.f32.mxu1 %vm439_vm1, %v2383_v1 }
 0x1e4   :  { %2394 = vtanh.f32 %v653_v2  ;;  %v2093_v7 = vpop.f32.mrb[12].mxu1  ;;  %2144 = vmatmul.mubr.msk.f32.vlgmr.msra.gmra.mrb[32].mxu1 %vm439_vm1, %v2385_v4  ;;  %v1619_v2 = vld [vmem:[%s2843_s28 + $0x10] sm:$0xff] }
 0x1e5   :  { %2396 = vtanh.f32 %v658_v63  ;;  %v668_v8 = vadd.f32 %v2093_v7, %v2766_v28  ;;  %v662_v9 = vpop.f32.mrb[13].mxu1  ;;  %2272 = vmatpush3.bf16.msra.mxu1 %v2760_v27 }
 0x1e6   :  { %v2387_v10 = vpop.eup %2386  ;;  %v663_v11 = vadd.f32 %v2766_v28, %v662_v9  ;;  %2274 = vmatprep.subr.bf16.mxu1 %v2273_v3 }
 0x1e7   :  { %v2389_v13 = vpop.eup %2388  ;;  %2146 = vmatprep.mubr.msk.f32.mxu1 %vm439_vm1, %v2387_v10 }
 0x1e8   :  { %2398 = vtanh.f32 %v663_v11  ;;  %v2096_v15 = vpop.f32.mrb[14].mxu1  ;;  %2147 = vmatmul.mubr.msk.f32.gmra.mrb[34].mxu1 %vm439_vm1, %v2389_v13 }
 0x1e9   :  { %2400 = vtanh.f32 %v668_v8  ;;  %v678_v16 = vadd.f32 %v2096_v15, %v2766_v28  ;;  %v672_v17 = vpop.f32.mrb[15].mxu1  ;;  %2276 = vmatpush3.bf16.msra.mxu1 %v2273_v3  ;;  %v1620_v3 = vld [vmem:[%s2843_s28 + $0x18] sm:$0xff] }
 0x1ea   :  { %v2391_v18 = vpop.eup %2390  ;;  %v673_v19 = vadd.f32 %v2766_v28, %v672_v17  ;;  %2286 = vmatprep.subr.bf16.mxu1 %v2285_v12  ;;  %v2305_v9 = vpack.c.bf16 %v1620_v3, %v1619_v2 }
 0x1eb   :  { %v2393_v21 = vpop.eup %2392  ;;  %2157 = vmatprep.mubr.msk.f32.mxu0 %vm439_vm1, %v2391_v18 }
 0x1ec   :  { %2402 = vtanh.f32 %v673_v19  ;;  %v2099_v24 = vpop.f32.mrb[16].mxu1  ;;  %2158 = vmatmul.mubr.msk.f32.vlgmr.msra.gmra.mrb[36].mxu0 %vm439_vm1, %v2393_v21 }
 0x1ed   :  { %2404 = vtanh.f32 %v678_v16  ;;  %v688_v25 = vadd.f32 %v2099_v24, %v2766_v28  ;;  %v682_v26 = vpop.f32.mrb[17].mxu1  ;;  %2280 = vmatpush3.bf16.msra.mxu0 %v2277_v58  ;;  %v2297_v58 = vpack.c.bf16 %v1503_v52, %v1502_v51 }
 0x1ee   :  { %v2395_v27 = vpop.eup %2394  ;;  %v683_v29 = vadd.f32 %v2766_v28, %v682_v26  ;;  %2282 = vmatprep.subr.bf16.mxu0 %v2281_v20 }
 0x1ef   :  { %v2397_v31 = vpop.eup %2396  ;;  %2160 = vmatprep.mubr.msk.f32.mxu0 %vm439_vm1, %v2395_v27  ;;  %v1825_v27 = vld [vmem:[%s801_s30] ss:$0 sm:$0xff] }
 0x1f0   :  { %2406 = vtanh.f32 %v683_v29  ;;  %v2102_v34 = vpop.f32.mrb[18].mxu1  ;;  %2161 = vmatmul.mubr.msk.f32.gmra.mrb[38].mxu0 %vm439_vm1, %v2397_v31 }
 0x1f1   :  { %2408 = vtanh.f32 %v688_v25  ;;  %v698_v35 = vadd.f32 %v2102_v34, %v2766_v28  ;;  %v692_v36 = vpop.f32.mrb[19].mxu1  ;;  %2284 = vmatpush3.bf16.msra.mxu0 %v2281_v20 }
 0x1f2   :  { %v2399_v37 = vpop.eup %2398  ;;  %v693_v38 = vadd.f32 %v2766_v28, %v692_v36  ;;  %2294 = vmatprep.subr.bf16.mxu0 %v2293_v30 }
 0x1f3   :  { %v2401_v40 = vpop.eup %2400  ;;  %2171 = vmatprep.mubr.msk.f32.mxu1 %vm439_vm1, %v2399_v37  ;;  %v1832_v37 = vld [vmem:[%s919_s14] ss:$0 sm:$0xff] }
 0x1f4   :  { %2410 = vtanh.f32 %v693_v38  ;;  %v2105_v43 = vpop.f32.mrb[20].mxu1  ;;  %2172 = vmatmul.mubr.msk.f32.vlgmr.msra.gmra.mrb[36].mxu1 %vm439_vm1, %v2401_v40 }
 0x1f5   :  { %2412 = vtanh.f32 %v698_v35  ;;  %v708_v44 = vadd.f32 %v2105_v43, %v2766_v28  ;;  %v702_v45 = vpop.f32.mrb[21].mxu1  ;;  %2288 = vmatpush3.bf16.msra.mxu1 %v2285_v12 }
 0x1f6   :  { %v2403_v46 = vpop.eup %2402  ;;  %v703_v48 = vadd.f32 %v2766_v28, %v702_v45  ;;  %2290 = vmatprep.subr.bf16.mxu1 %v2289_v39 }
 0x1f7   :  { %v2405_v50 = vpop.eup %2404  ;;  %2174 = vmatprep.mubr.msk.f32.mxu1 %vm439_vm1, %v2403_v46  ;;  %v1839_v46 = vld [vmem:[%s1036_s23] ss:$0 sm:$0xff] }
 0x1f8   :  { %2414 = vtanh.f32 %v703_v48  ;;  %v2108_v53 = vpop.f32.mrb[22].mxu1  ;;  %2175 = vmatmul.mubr.msk.f32.gmra.mrb[38].mxu1 %vm439_vm1, %v2405_v50 }
 0x1f9   :  { %2416 = vtanh.f32 %v708_v44  ;;  %v718_v54 = vadd.f32 %v2108_v53, %v2766_v28  ;;  %v712_v55 = vpop.f32.mrb[23].mxu1  ;;  %2292 = vmatpush3.bf16.msra.mxu1 %v2289_v39 }
 0x1fa   :  { %v2407_v56 = vpop.eup %2406  ;;  %v713_v57 = vadd.f32 %v2766_v28, %v712_v55  ;;  %2302 = vmatprep.subr.bf16.mxu1 %v2301_v49 }
 0x1fb   :  { %v2409_v59 = vpop.eup %2408  ;;  %2185 = vmatprep.mubr.msk.f32.mxu0 %vm439_vm1, %v2407_v56  ;;  %v1846_v56 = vld [vmem:[%s1153_s5] ss:$0 sm:$0xff] }
 0x1fc   :  { %2418 = vtanh.f32 %v713_v57  ;;  %v2111_v60 = vpop.f32.mrb[24].mxu1  ;;  %2186 = vmatmul.mubr.msk.f32.vlgmr.msra.gmra.mrb[40].mxu0 %vm439_vm1, %v2409_v59 }
 0x1fd   :  { %2420 = vtanh.f32 %v718_v54  ;;  %v728_v61 = vadd.f32 %v2111_v60, %v2766_v28  ;;  %v722_v62 = vpop.f32.mrb[25].mxu1  ;;  %2296 = vmatpush3.bf16.msra.mxu0 %v2293_v30 }
 0x1fe   :  { %v2411_v63 = vpop.eup %2410  ;;  %v723_v0 = vadd.f32 %v2766_v28, %v722_v62  ;;  %2298 = vmatprep.subr.bf16.mxu0 %v2297_v58 }
 0x1ff   :  { %v2413_v1 = vpop.eup %2412  ;;  %2188 = vmatprep.mubr.msk.f32.mxu0 %vm439_vm1, %v2411_v63 }
 0x200   :  { %2422 = vtanh.f32 %v723_v0  ;;  %v2114_v4 = vpop.f32.mrb[26].mxu1  ;;  %2189 = vmatmul.mubr.msk.f32.gmra.mrb[42].mxu0 %vm439_vm1, %v2413_v1  ;;  %v1853_v1 = vld [vmem:[%s1270_s4] ss:$0 sm:$0xff] }
 0x201   :  { %2424 = vtanh.f32 %v728_v61  ;;  %v738_v5 = vadd.f32 %v2114_v4, %v2766_v28  ;;  %v732_v6 = vpop.f32.mrb[27].mxu1  ;;  %2300 = vmatpush3.bf16.msra.mxu0 %v2297_v58 }
 0x202   :  { %v2415_v7 = vpop.eup %2414  ;;  %v733_v8 = vadd.f32 %v2766_v28, %v732_v6 }
 0x203   :  { %v2417_v10 = vpop.eup %2416  ;;  %2199 = vmatprep.mubr.msk.f32.mxu1 %vm439_vm1, %v2415_v7 }
 0x204   :  { %2426 = vtanh.f32 %v733_v8  ;;  %v2117_v11 = vpop.f32.mrb[28].mxu1  ;;  %2200 = vmatmul.mubr.msk.f32.vlgmr.msra.gmra.mrb[40].mxu1 %vm439_vm1, %v2417_v10  ;;  %v1860_v10 = vld [vmem:[%s1387_s3] ss:$0 sm:$0xff] }
 0x205   :  { %2428 = vtanh.f32 %v738_v5  ;;  %v748_v12 = vadd.f32 %v2117_v11, %v2766_v28  ;;  %v742_v13 = vpop.f32.mrb[29].mxu1  ;;  %2304 = vmatpush3.bf16.msra.mxu1 %v2301_v49 }
 0x206   :  { %v2419_v14 = vpop.eup %2418  ;;  %v743_v47 = vadd.f32 %v2766_v28, %v742_v13  ;;  %2306 = vmatprep.subr.bf16.mxu1 %v2305_v9 }
 0x207   :  { %v2421_v15 = vpop.eup %2420  ;;  %2202 = vmatprep.mubr.msk.f32.mxu1 %vm439_vm1, %v2419_v14 }
 0x208   :  { %2430 = vtanh.f32 %v743_v47  ;;  %v2120_v16 = vpop.f32.mrb[30].mxu1  ;;  %2203 = vmatmul.mubr.msk.f32.gmra.mrb[42].mxu1 %vm439_vm1, %v2421_v15 }
 0x209   :  { %2432 = vtanh.f32 %v748_v12  ;;  %v758_v17 = vadd.f32 %v2120_v16, %v2766_v28  ;;  %v752_v18 = vpop.f32.mrb[31].mxu1  ;;  %2308 = vmatpush3.bf16.msra.mxu1 %v2305_v9 }
 0x20a   :  { %v2423_v19 = vpop.eup %2422  ;;  %v753_v20 = vadd.f32 %v2766_v28, %v752_v18  ;;  %v1867_v18 = vld [vmem:[%s1504_s18] ss:$0 sm:$0xff] }
 0x20b   :  { %v2425_v21 = vpop.eup %2424  ;;  %2213 = vmatprep.mubr.msk.f32.mxu0 %vm439_vm1, %v2423_v19 }
 0x20c   :  { %2434 = vtanh.f32 %v753_v20  ;;  %2214 = vmatmul.mubr.msk.f32.vlgmr.msra.gmra.mrb[44].mxu0 %vm439_vm1, %v2425_v21 }
 0x20d   :  { %2436 = vtanh.f32 %v758_v17 }
 0x20e   :  { %v2427_v22 = vpop.eup %2426 }
 0x20f   :  { %v2429_v23 = vpop.eup %2428  ;;  %2216 = vmatprep.mubr.msk.f32.mxu0 %vm439_vm1, %v2427_v22 }
 0x210   :  { %2217 = vmatmul.mubr.msk.f32.gmra.mrb[46].mxu0 %vm439_vm1, %v2429_v23 }
 0x212   :  { %v2431_v24 = vpop.eup %2430 }
 0x213   :  { %v2433_v25 = vpop.eup %2432  ;;  %2227 = vmatprep.mubr.msk.f32.mxu1 %vm439_vm1, %v2431_v24 }
 0x214   :  { %2228 = vmatmul.mubr.msk.f32.vlgmr.msra.gmra.mrb[44].mxu1 %vm439_vm1, %v2433_v25 }
 0x216   :  { %v2435_v28 = vpop.eup %2434 }
 0x217   :  { %v2437_v26 = vpop.eup %2436  ;;  %2230 = vmatprep.mubr.msk.f32.mxu1 %vm439_vm1, %v2435_v28 }
 0x218   :  { %2231 = vmatmul.mubr.msk.f32.gmra.mrb[46].mxu1 %vm439_vm1, %v2437_v26  ;;  %v1874_v26 = vld [vmem:[%s1621_s25] ss:$0 sm:$0xff] }
 0x2af   :  { %v2131_v29 = vpop.f32.mrb[32].mxu0 }
 0x2b0   :  { %v893_v30 = vadd.f32 %v2131_v29, %v1825_v27  ;;  %v887_v31 = vpop.f32.mrb[33].mxu0 }
 0x2b1   :  { %v888_v32 = vadd.f32 %v1825_v27, %v887_v31 }
 0x2b2   :  { %908 = vst.msk [vmem:[%s3053_s8 + $0x8] sm:$0xff] %vm906_vm2, %v893_v30 }
 0x2b3   :  { %907 = vst.msk [vmem:[%s3053_s8] sm:$0xff] %vm906_vm2, %v888_v32  ;;  %v2134_v33 = vpop.f32.mrb[34].mxu0 }
 0x2b4   :  { %v903_v34 = vadd.f32 %v2134_v33, %v1825_v27  ;;  %v897_v35 = vpop.f32.mrb[35].mxu0 }
 0x2b5   :  { %v898_v36 = vadd.f32 %v1825_v27, %v897_v35 }
 0x2b6   :  { %910 = vst.msk [vmem:[%s3053_s8 + $0x18] sm:$0xff] %vm906_vm2, %v903_v34 }
 0x2b7   :  { %909 = vst.msk [vmem:[%s3053_s8 + $0x10] sm:$0xff] %vm906_vm2, %v898_v36  ;;  %v2145_v38 = vpop.f32.mrb[32].mxu1 }
 0x2b8   :  { %v1011_v39 = vadd.f32 %v2145_v38, %v1832_v37  ;;  %v1005_v40 = vpop.f32.mrb[33].mxu1 }
 0x2b9   :  { %v1006_v41 = vadd.f32 %v1832_v37, %v1005_v40 }
 0x2ba   :  { %1025 = vst.msk [vmem:[%s3053_s8 + $0x28] sm:$0xff] %vm906_vm2, %v1011_v39 }
 0x2bb   :  { %1024 = vst.msk [vmem:[%s3053_s8 + $0x20] sm:$0xff] %vm906_vm2, %v1006_v41  ;;  %v2148_v42 = vpop.f32.mrb[34].mxu1 }
 0x2bc   :  { %v1021_v43 = vadd.f32 %v2148_v42, %v1832_v37  ;;  %v1015_v44 = vpop.f32.mrb[35].mxu1 }
 0x2bd   :  { %v1016_v45 = vadd.f32 %v1832_v37, %v1015_v44 }
 0x2be   :  { %1027 = vst.msk [vmem:[%s3053_s8 + $0x38] sm:$0xff] %vm906_vm2, %v1021_v43 }
 0x2bf   :  { %1026 = vst.msk [vmem:[%s3053_s8 + $0x30] sm:$0xff] %vm906_vm2, %v1016_v45  ;;  %v2159_v48 = vpop.f32.mrb[36].mxu0 }
 0x2c0   :  { %v1128_v49 = vadd.f32 %v2159_v48, %v1839_v46  ;;  %v1122_v50 = vpop.f32.mrb[37].mxu0 }
 0x2c1   :  { %v1123_v51 = vadd.f32 %v1839_v46, %v1122_v50 }
 0x2c2   :  { %1142 = vst.msk [vmem:[%s3053_s8 + $0x48] sm:$0xff] %vm906_vm2, %v1128_v49 }
 0x2c3   :  { %1141 = vst.msk [vmem:[%s3053_s8 + $0x40] sm:$0xff] %vm906_vm2, %v1123_v51  ;;  %v2162_v52 = vpop.f32.mrb[38].mxu0 }
 0x2c4   :  { %v1138_v53 = vadd.f32 %v2162_v52, %v1839_v46  ;;  %v1132_v54 = vpop.f32.mrb[39].mxu0 }
 0x2c5   :  { %v1133_v55 = vadd.f32 %v1839_v46, %v1132_v54 }
 0x2c6   :  { %1144 = vst.msk [vmem:[%s3053_s8 + $0x58] sm:$0xff] %vm906_vm2, %v1138_v53 }
 0x2c7   :  { %1143 = vst.msk [vmem:[%s3053_s8 + $0x50] sm:$0xff] %vm906_vm2, %v1133_v55  ;;  %v2173_v57 = vpop.f32.mrb[36].mxu1 }
 0x2c8   :  { %v1245_v58 = vadd.f32 %v2173_v57, %v1846_v56  ;;  %v1239_v59 = vpop.f32.mrb[37].mxu1 }
 0x2c9   :  { %v1240_v60 = vadd.f32 %v1846_v56, %v1239_v59 }
 0x2ca   :  { %1259 = vst.msk [vmem:[%s3053_s8 + $0x68] sm:$0xff] %vm906_vm2, %v1245_v58 }
 0x2cb   :  { %1258 = vst.msk [vmem:[%s3053_s8 + $0x60] sm:$0xff] %vm906_vm2, %v1240_v60  ;;  %v2176_v61 = vpop.f32.mrb[38].mxu1 }
 0x2cc   :  { %v1255_v62 = vadd.f32 %v2176_v61, %v1846_v56  ;;  %v1249_v63 = vpop.f32.mrb[39].mxu1 }
 0x2cd   :  { %v1250_v0 = vadd.f32 %v1846_v56, %v1249_v63 }
 0x2ce   :  { %1261 = vst.msk [vmem:[%s3053_s8 + $0x78] sm:$0xff] %vm906_vm2, %v1255_v62 }
 0x2cf   :  { %1260 = vst.msk [vmem:[%s3053_s8 + $0x70] sm:$0xff] %vm906_vm2, %v1250_v0  ;;  %v2187_v2 = vpop.f32.mrb[40].mxu0 }
 0x2d0   :  { %v1362_v3 = vadd.f32 %v2187_v2, %v1853_v1  ;;  %v1356_v4 = vpop.f32.mrb[41].mxu0 }
 0x2d1   :  { %v1357_v5 = vadd.f32 %v1853_v1, %v1356_v4 }
 0x2d2   :  { %1376 = vst.msk [vmem:[%s3053_s8 + $0x88] sm:$0xff] %vm906_vm2, %v1362_v3 }
 0x2d3   :  { %1375 = vst.msk [vmem:[%s3053_s8 + $0x80] sm:$0xff] %vm906_vm2, %v1357_v5  ;;  %v2190_v6 = vpop.f32.mrb[42].mxu0 }
 0x2d4   :  { %v1372_v7 = vadd.f32 %v2190_v6, %v1853_v1  ;;  %v1366_v8 = vpop.f32.mrb[43].mxu0 }
 0x2d5   :  { %v1367_v9 = vadd.f32 %v1853_v1, %v1366_v8 }
 0x2d6   :  { %1378 = vst.msk [vmem:[%s3053_s8 + $0x98] sm:$0xff] %vm906_vm2, %v1372_v7 }
 0x2d7   :  { %1377 = vst.msk [vmem:[%s3053_s8 + $0x90] sm:$0xff] %vm906_vm2, %v1367_v9  ;;  %v2201_v11 = vpop.f32.mrb[40].mxu1 }
 0x2d8   :  { %v1479_v12 = vadd.f32 %v2201_v11, %v1860_v10  ;;  %v1473_v13 = vpop.f32.mrb[41].mxu1 }
 0x2d9   :  { %v1474_v14 = vadd.f32 %v1860_v10, %v1473_v13 }
 0x2da   :  { %1493 = vst.msk [vmem:[%s3053_s8 + $0xa8] sm:$0xff] %vm906_vm2, %v1479_v12 }
 0x2db   :  { %1492 = vst.msk [vmem:[%s3053_s8 + $0xa0] sm:$0xff] %vm906_vm2, %v1474_v14  ;;  %v2204_v47 = vpop.f32.mrb[42].mxu1 }
 0x2dc   :  { %v1489_v15 = vadd.f32 %v2204_v47, %v1860_v10  ;;  %v1483_v16 = vpop.f32.mrb[43].mxu1 }
 0x2dd   :  { %v1484_v17 = vadd.f32 %v1860_v10, %v1483_v16 }
 0x2de   :  { %1495 = vst.msk [vmem:[%s3053_s8 + $0xb8] sm:$0xff] %vm906_vm2, %v1489_v15 }
 0x2df   :  { %1494 = vst.msk [vmem:[%s3053_s8 + $0xb0] sm:$0xff] %vm906_vm2, %v1484_v17  ;;  %v2215_v19 = vpop.f32.mrb[44].mxu0 }
 0x2e0   :  { %v1596_v20 = vadd.f32 %v2215_v19, %v1867_v18  ;;  %v1590_v21 = vpop.f32.mrb[45].mxu0 }
 0x2e1   :  { %v1591_v22 = vadd.f32 %v1867_v18, %v1590_v21 }
 0x2e2   :  { %1610 = vst.msk [vmem:[%s3053_s8 + $0xc8] sm:$0xff] %vm906_vm2, %v1596_v20 }
 0x2e3   :  { %1609 = vst.msk [vmem:[%s3053_s8 + $0xc0] sm:$0xff] %vm906_vm2, %v1591_v22  ;;  %v2218_v23 = vpop.f32.mrb[46].mxu0 }
 0x2e4   :  { %v1606_v24 = vadd.f32 %v2218_v23, %v1867_v18  ;;  %v1600_v25 = vpop.f32.mrb[47].mxu0 }
 0x2e5   :  { %v1601_v28 = vadd.f32 %v1867_v18, %v1600_v25 }
 0x2e6   :  { %1612 = vst.msk [vmem:[%s3053_s8 + $0xd8] sm:$0xff] %vm906_vm2, %v1606_v24 }
 0x2e7   :  { %1611 = vst.msk [vmem:[%s3053_s8 + $0xd0] sm:$0xff] %vm906_vm2, %v1601_v28  ;;  %v2229_v27 = vpop.f32.mrb[44].mxu1 }
 0x2e8   :  { %v1713_v29 = vadd.f32 %v2229_v27, %v1874_v26  ;;  %v1707_v30 = vpop.f32.mrb[45].mxu1 }
 0x2e9   :  { %v1708_v31 = vadd.f32 %v1874_v26, %v1707_v30 }
 0x2ea   :  { %1727 = vst.msk [vmem:[%s3053_s8 + $0xe8] sm:$0xff] %vm906_vm2, %v1713_v29 }
 0x2eb   :  { %1726 = vst.msk [vmem:[%s3053_s8 + $0xe0] sm:$0xff] %vm906_vm2, %v1708_v31  ;;  %v2232_v32 = vpop.f32.mrb[46].mxu1 }
 0x2ec   :  { %v1723_v33 = vadd.f32 %v2232_v32, %v1874_v26  ;;  %v1717_v34 = vpop.f32.mrb[47].mxu1 }
 0x2ed   :  { %v1718_v35 = vadd.f32 %v1874_v26, %v1717_v34 }
 0x2ee   :  { %1729 = vst.msk [vmem:[%s3053_s8 + $0xf8] sm:$0xff] %vm906_vm2, %v1723_v33 }
 0x2ef   :  { %1728 = vst.msk [vmem:[%s3053_s8 + $0xf0] sm:$0xff] %vm906_vm2, %v1718_v35 }

</bundles_post_ra>
